<compile_context>
chip_gen: v7x
topology: tpu7x:2x2x1
jax: 0.10.0
libtpu: 0.0.40
codegen_flags: <defaults>
</compile_context>

<pallas_src>
import jax
import jax.numpy as jnp
from jax.experimental import pallas as pl
from jax.experimental.pallas import tpu as pltpu

INPUT_DIM = 3 * 3 * 3 + 2   # 29
HIDDEN_DIM = 128
OUTPUT_DIM = 4
LANE = 128


def _round_up(x, m):
    return ((x + m - 1) // m) * m


def actor_critic_kernel(x_ref, wp_ref, bp_ref, w1_ref, b1_ref, w2_ref, b2_ref, o_ref):
    # projector: [TILE_T, IN_PAD](bf16) @ [IN_PAD, H](bf16) -> f32
    h0 = jnp.dot(x_ref[...], wp_ref[...], preferred_element_type=jnp.float32)
    h0 = h0 + bp_ref[...]
    # fused actor|critic fc_1: [TILE_T, H] @ [H, 2H] -> [TILE_T, 2H]
    h1 = jnp.dot(h0.astype(jnp.bfloat16), w1_ref[...],
                 preferred_element_type=jnp.float32)
    h1 = h1 + b1_ref[...]
    # dropout (eval mode) -> identity; then relu
    h1 = jnp.maximum(h1, 0.0)
    # fused actor|critic fc_2 (block-diagonal): [TILE_T, 2H] @ [2H, 128]
    out = jnp.dot(h1.astype(jnp.bfloat16), w2_ref[...],
                  preferred_element_type=jnp.float32)
    out = out + b2_ref[...]
    o_ref[...] = out.astype(o_ref.dtype)


def actor_critic_forward(state, params, *, tile_t=256):
    """state: [N_agents, T, INPUT_DIM] f32 -> (actions [N,T,4], values [N,T,1], CBloss)."""
    n_agents, t, in_dim = state.shape
    h = HIDDEN_DIM
    out_dim = OUTPUT_DIM
    in_pad = _round_up(in_dim, LANE)
    out_pad = LANE                       # lanes [0:4] = actions, lane [4] = value
    tile_t = min(tile_t, _round_up(t, 8))
    t_pad = _round_up(t, tile_t)

    # ---- pack & pad operands (layout plumbing outside the kernel) ----
    x = jnp.zeros((n_agents, t_pad, in_pad), jnp.float32)
    x = x.at[:, :t, :in_dim].set(state).astype(jnp.bfloat16)

    wp = jnp.zeros((in_pad, h), jnp.float32).at[:in_dim, :].set(params["wp"])
    wp = wp.astype(jnp.bfloat16)
    bp = params["bp"].reshape(1, h).astype(jnp.float32)

    # per-agent fc_1: actor & critic hidden concatenated along lanes -> [N, H, 2H]
    w1 = jnp.concatenate([params["a_w1"], params["c_w1"]], axis=-1).astype(jnp.bfloat16)
    b1 = jnp.concatenate([params["a_b1"], params["c_b1"]], axis=-1)
    b1 = b1.reshape(n_agents, 1, 2 * h).astype(jnp.float32)

    # per-agent fc_2: block-diagonal [N, 2H, 128]; actor -> lanes 0:4, critic -> lane 4
    w2 = jnp.zeros((n_agents, 2 * h, out_pad), jnp.float32)
    w2 = w2.at[:, :h, :out_dim].set(params["a_w2"])
    w2 = w2.at[:, h:, out_dim:out_dim + 1].set(params["c_w2"])
    w2 = w2.astype(jnp.bfloat16)
    b2 = jnp.zeros((n_agents, 1, out_pad), jnp.float32)
    b2 = b2.at[:, :, :out_dim].set(params["a_b2"].reshape(n_agents, 1, out_dim))
    b2 = b2.at[:, :, out_dim:out_dim + 1].set(params["c_b2"].reshape(n_agents, 1, 1))

    grid = (n_agents, t_pad // tile_t)
    out = pl.pallas_call(
        actor_critic_kernel,
        out_shape=jax.ShapeDtypeStruct((n_agents, t_pad, out_pad), jnp.float32),
        grid_spec=pltpu.PrefetchScalarGridSpec(
            num_scalar_prefetch=0,
            grid=grid,
            in_specs=[
                pl.BlockSpec((None, tile_t, in_pad), lambda a, ti: (a, ti, 0)),   # x
                pl.BlockSpec((in_pad, h), lambda a, ti: (0, 0)),                  # wp
                pl.BlockSpec((1, h), lambda a, ti: (0, 0)),                       # bp
                pl.BlockSpec((None, h, 2 * h), lambda a, ti: (a, 0, 0)),          # w1
                pl.BlockSpec((None, 1, 2 * h), lambda a, ti: (a, 0, 0)),          # b1
                pl.BlockSpec((None, 2 * h, out_pad), lambda a, ti: (a, 0, 0)),    # w2
                pl.BlockSpec((None, 1, out_pad), lambda a, ti: (a, 0, 0)),        # b2
            ],
            out_specs=pl.BlockSpec((None, tile_t, out_pad), lambda a, ti: (a, ti, 0)),
        ),
        compiler_params=pltpu.CompilerParams(
            dimension_semantics=("parallel", "parallel"),
            vmem_limit_bytes=64 * 1024 * 1024,
        ),
    )(x, wp, bp, w1, b1, w2, b2)

    actions = out[:, :t, :out_dim]
    values = out[:, :t, out_dim:out_dim + 1]
    cb_loss = jnp.float32(0.0)           # args.Method == 'Original'
    return actions, values, cb_loss


def init_params(key, n_agents, input_dim=INPUT_DIM, hidden_dim=HIDDEN_DIM,
                output_dim=OUTPUT_DIM):
    """nn.Linear-style init (uniform(-1/sqrt(fan_in), 1/sqrt(fan_in))), weights
    stored pre-transposed ([in, out]) relative to torch."""
    def linear(k, fan_in, fan_out, batch=()):
        kw, kb = jax.random.split(k)
        bound = 1.0 / float(fan_in) ** 0.5
        w = jax.random.uniform(kw, batch + (fan_in, fan_out), jnp.float32, -bound, bound)
        b = jax.random.uniform(kb, batch + (fan_out,), jnp.float32, -bound, bound)
        return w, b

    k = jax.random.split(key, 5)
    wp, bp = linear(k[0], input_dim, hidden_dim)
    a_w1, a_b1 = linear(k[1], hidden_dim, hidden_dim, (n_agents,))
    a_w2, a_b2 = linear(k[2], hidden_dim, output_dim, (n_agents,))
    c_w1, c_b1 = linear(k[3], hidden_dim, hidden_dim, (n_agents,))
    c_w2, c_b2 = linear(k[4], hidden_dim, 1, (n_agents,))
    return dict(wp=wp, bp=bp,
                a_w1=a_w1, a_b1=a_b1, a_w2=a_w2, a_b2=a_b2,
                c_w1=c_w1, c_b1=c_b1, c_w2=c_w2, c_b2=c_b2)


def reference_forward(state, params):
    """Plain-JAX reference mirroring the kernel's bf16 matmul-input casts
    (f32 accumulation, f32 bias adds)."""
    bf = jnp.bfloat16
    h0 = jnp.einsum("atd,dh->ath", state.astype(bf), params["wp"].astype(bf),
                    preferred_element_type=jnp.float32) + params["bp"]

    def mlp(hid, w1, b1, w2, b2):
        z = jnp.einsum("ath,ahk->atk", hid.astype(bf), w1.astype(bf),
                       preferred_element_type=jnp.float32) + b1[:, None, :]
        z = jnp.maximum(z, 0.0)
        return jnp.einsum("atk,ako->ato", z.astype(bf), w2.astype(bf),
                          preferred_element_type=jnp.float32) + b2[:, None, :]

    actions = mlp(h0, params["a_w1"], params["a_b1"], params["a_w2"], params["a_b2"])
    values = mlp(h0, params["c_w1"], params["c_b1"], params["c_w2"], params["c_b2"])
    return actions, values


if __name__ == "__main__":
    key = jax.random.PRNGKey(0)
    n_agents, T = 2, 8

    kx, kp = jax.random.split(key)
    state = jax.random.normal(kx, (n_agents, T, INPUT_DIM), jnp.float32)
    params = init_params(kp, n_agents)

    actions, values, cb_loss = actor_critic_forward(state, params)
    actions = jax.block_until_ready(actions)
    values = jax.block_until_ready(values)

    assert actions.shape == (n_agents, T, OUTPUT_DIM)
    assert values.shape == (n_agents, T, 1)
    assert float(cb_loss) == 0.0

    ref_actions, ref_values = reference_forward(state, params)
    assert jnp.allclose(actions, ref_actions, atol=2e-2, rtol=2e-2)
    assert jnp.allclose(values, ref_values, atol=2e-2, rtol=2e-2)

    print("KERNEL_OK")
</pallas_src>

<mosaic_0001>
module attributes {stable_mosaic.version = 11 : i64} {
  func.func @actor_critic_kernel(%arg0: i32, %arg1: i32, %arg2: memref<1x8x128xbf16, #tpu.memory_space<vmem>>, %arg3: memref<128x128xbf16, #tpu.memory_space<vmem>>, %arg4: memref<1x128xf32, #tpu.memory_space<vmem>>, %arg5: memref<1x128x256xbf16, #tpu.memory_space<vmem>>, %arg6: memref<1x1x256xf32, #tpu.memory_space<vmem>>, %arg7: memref<1x256x128xbf16, #tpu.memory_space<vmem>>, %arg8: memref<1x1x128xf32, #tpu.memory_space<vmem>>, %arg9: memref<1x8x128xf32, #tpu.memory_space<vmem>>) attributes {dimension_semantics = [#tpu.dimension_semantics<parallel>, #tpu.dimension_semantics<parallel>], iteration_bounds = array<i64: 2, 1>, scalar_prefetch = 0 : i64, scratch_operands = 0 : i64, tpu.core_type = #tpu.core_type<tc>, window_params = [{transform_indices = @transform_0, window_bounds = array<i64: 1, 8, 128>}, {pipeline_mode = #tpu.pipeline_mode<synchronous>, transform_indices = @transform_1, window_bounds = array<i64: 128, 128>}, {pipeline_mode = #tpu.pipeline_mode<synchronous>, transform_indices = @transform_2, window_bounds = array<i64: 1, 128>}, {transform_indices = @transform_3, window_bounds = array<i64: 1, 128, 256>}, {transform_indices = @transform_4, window_bounds = array<i64: 1, 1, 256>}, {transform_indices = @transform_5, window_bounds = array<i64: 1, 256, 128>}, {transform_indices = @transform_6, window_bounds = array<i64: 1, 1, 128>}, {transform_indices = @transform_7, window_bounds = array<i64: 1, 8, 128>}]} {
    %c0 = arith.constant 0 : index
    %c0_0 = arith.constant 0 : index
    %c0_1 = arith.constant 0 : index
    %0 = vector.load %arg2[%c0, %c0_0, %c0_1] : memref<1x8x128xbf16, #tpu.memory_space<vmem>>, vector<1x8x128xbf16>
    %1 = vector.shape_cast %0 : vector<1x8x128xbf16> to vector<8x128xbf16>
    %c0_2 = arith.constant 0 : index
    %c0_3 = arith.constant 0 : index
    %2 = vector.load %arg3[%c0_2, %c0_3] : memref<128x128xbf16, #tpu.memory_space<vmem>>, vector<128x128xbf16>
    %cst = arith.constant dense<0.000000e+00> : vector<8x128xf32>
    %3 = tpu.matmul %1, %2, %cst {dimension_numbers = #tpu.dot_dimension_numbers<[1], [0], [0], [1], [0, 0, 1, 1], [], []>} : vector<8x128xbf16>, vector<128x128xbf16>, vector<8x128xf32> -> vector<8x128xf32>
    %c0_4 = arith.constant 0 : index
    %c0_5 = arith.constant 0 : index
    %4 = vector.load %arg4[%c0_4, %c0_5] : memref<1x128xf32, #tpu.memory_space<vmem>>, vector<1x128xf32>
    %5 = vector.broadcast %4 : vector<1x128xf32> to vector<8x128xf32>
    %6 = arith.addf %3, %5 : vector<8x128xf32>
    %7 = arith.truncf %6 : vector<8x128xf32> to vector<8x128xbf16>
    %c0_6 = arith.constant 0 : index
    %c0_7 = arith.constant 0 : index
    %c0_8 = arith.constant 0 : index
    %8 = vector.load %arg5[%c0_6, %c0_7, %c0_8] : memref<1x128x256xbf16, #tpu.memory_space<vmem>>, vector<1x128x256xbf16>
    %9 = vector.shape_cast %8 : vector<1x128x256xbf16> to vector<128x256xbf16>
    %cst_9 = arith.constant dense<0.000000e+00> : vector<8x256xf32>
    %10 = tpu.matmul %7, %9, %cst_9 {dimension_numbers = #tpu.dot_dimension_numbers<[1], [0], [0], [1], [0, 0, 1, 1], [], []>} : vector<8x128xbf16>, vector<128x256xbf16>, vector<8x256xf32> -> vector<8x256xf32>
    %c0_10 = arith.constant 0 : index
    %c0_11 = arith.constant 0 : index
    %c0_12 = arith.constant 0 : index
    %11 = vector.load %arg6[%c0_10, %c0_11, %c0_12] : memref<1x1x256xf32, #tpu.memory_space<vmem>>, vector<1x1x256xf32>
    %12 = vector.shape_cast %11 : vector<1x1x256xf32> to vector<1x256xf32>
    %13 = vector.broadcast %12 : vector<1x256xf32> to vector<8x256xf32>
    %14 = arith.addf %10, %13 : vector<8x256xf32>
    %cst_13 = arith.constant 0.000000e+00 : f32
    %15 = vector.broadcast %cst_13 : f32 to vector<8x256xf32>
    %16 = arith.maximumf %14, %15 : vector<8x256xf32>
    %17 = arith.truncf %16 : vector<8x256xf32> to vector<8x256xbf16>
    %c0_14 = arith.constant 0 : index
    %c0_15 = arith.constant 0 : index
    %c0_16 = arith.constant 0 : index
    %18 = vector.load %arg7[%c0_14, %c0_15, %c0_16] : memref<1x256x128xbf16, #tpu.memory_space<vmem>>, vector<1x256x128xbf16>
    %19 = vector.shape_cast %18 : vector<1x256x128xbf16> to vector<256x128xbf16>
    %cst_17 = arith.constant dense<0.000000e+00> : vector<8x128xf32>
    %20 = tpu.matmul %17, %19, %cst_17 {dimension_numbers = #tpu.dot_dimension_numbers<[1], [0], [0], [1], [0, 0, 1, 1], [], []>} : vector<8x256xbf16>, vector<256x128xbf16>, vector<8x128xf32> -> vector<8x128xf32>
    %c0_18 = arith.constant 0 : index
    %c0_19 = arith.constant 0 : index
    %c0_20 = arith.constant 0 : index
    %21 = vector.load %arg8[%c0_18, %c0_19, %c0_20] : memref<1x1x128xf32, #tpu.memory_space<vmem>>, vector<1x1x128xf32>
    %22 = vector.shape_cast %21 : vector<1x1x128xf32> to vector<1x128xf32>
    %23 = vector.broadcast %22 : vector<1x128xf32> to vector<8x128xf32>
    %24 = arith.addf %20, %23 : vector<8x128xf32>
    %c0_21 = arith.constant 0 : index
    %c0_22 = arith.constant 0 : index
    %c0_23 = arith.constant 0 : index
    %25 = vector.load %arg9[%c0_21, %c0_22, %c0_23] : memref<1x8x128xf32, #tpu.memory_space<vmem>>, vector<1x8x128xf32>
    %26 = vector.shape_cast %25 : vector<1x8x128xf32> to vector<8x128xf32>
    %27 = vector.shape_cast %24 : vector<8x128xf32> to vector<1x8x128xf32>
    tpu.vector_store %arg9[%c0_21, %c0_22, %c0_23], %27 {strides = array<i32>} : memref<1x8x128xf32, #tpu.memory_space<vmem>>, vector<1x8x128xf32>,
    return
  }
  func.func @transform_0(%arg0: i32, %arg1: i32) -> (i32, i32, i32) {
    %c0_i32 = arith.constant 0 : i32
    %c0_i32_0 = arith.constant 0 : i32
    return %arg0, %arg1, %c0_i32 : i32, i32, i32
  }
  func.func @transform_1(%arg0: i32, %arg1: i32) -> (i32, i32) {
    %c0_i32 = arith.constant 0 : i32
    %c0_i32_0 = arith.constant 0 : i32
    %c0_i32_1 = arith.constant 0 : i32
    return %c0_i32, %c0_i32_0 : i32, i32
  }
  func.func @transform_2(%arg0: i32, %arg1: i32) -> (i32, i32) {
    %c0_i32 = arith.constant 0 : i32
    %c0_i32_0 = arith.constant 0 : i32
    %c0_i32_1 = arith.constant 0 : i32
    return %c0_i32, %c0_i32_0 : i32, i32
  }
  func.func @transform_3(%arg0: i32, %arg1: i32) -> (i32, i32, i32) {
    %c0_i32 = arith.constant 0 : i32
    %c0_i32_0 = arith.constant 0 : i32
    %c0_i32_1 = arith.constant 0 : i32
    return %arg0, %c0_i32, %c0_i32_0 : i32, i32, i32
  }
  func.func @transform_4(%arg0: i32, %arg1: i32) -> (i32, i32, i32) {
    %c0_i32 = arith.constant 0 : i32
    %c0_i32_0 = arith.constant 0 : i32
    %c0_i32_1 = arith.constant 0 : i32
    return %arg0, %c0_i32, %c0_i32_0 : i32, i32, i32
  }
  func.func @transform_5(%arg0: i32, %arg1: i32) -> (i32, i32, i32) {
    %c0_i32 = arith.constant 0 : i32
    %c0_i32_0 = arith.constant 0 : i32
    %c0_i32_1 = arith.constant 0 : i32
    return %arg0, %c0_i32, %c0_i32_0 : i32, i32, i32
  }
  func.func @transform_6(%arg0: i32, %arg1: i32) -> (i32, i32, i32) {
    %c0_i32 = arith.constant 0 : i32
    %c0_i32_0 = arith.constant 0 : i32
    %c0_i32_1 = arith.constant 0 : i32
    return %arg0, %c0_i32, %c0_i32_0 : i32, i32, i32
  }
  func.func @transform_7(%arg0: i32, %arg1: i32) -> (i32, i32, i32) {
    %c0_i32 = arith.constant 0 : i32
    %c0_i32_0 = arith.constant 0 : i32
    return %arg0, %arg1, %c0_i32 : i32, i32, i32
  }
}

</mosaic_0001>

<bundles_post_ra>
// kernel: tpu_custom_call.1
= control target key start
LH: loop header
LB: loop body
LE: loop exit
PB: predicated region body
PF: predicated region fallthrough
CT: control target
= control target key end

     0   :  { %s2205_s0 = inlined_call_operand.hbm [shape: bf16[2,8,128], index: 0, kind: input, shape index: {}]   ;;  %s2206_s1 = inlined_call_operand.hbm [shape: bf16[128,128], index: 1, kind: input, shape index: {}]   ;;  %s2207_s2 = inlined_call_operand.hbm [shape: f32[1,128], index: 2, kind: input, shape index: {}]   ;;  %s2208_s3 = inlined_call_operand.hbm [shape: bf16[2,128,256], index: 3, kind: input, shape index: {}]   ;;  %s2209_s4 = inlined_call_operand.hbm [shape: f32[2,1,256], index: 4, kind: input, shape index: {}]   ;;  %s2210_s5 = inlined_call_operand.hbm [shape: bf16[2,256,128], index: 5, kind: input, shape index: {}]   ;;  %s2211_s6 = inlined_call_operand.hbm [shape: f32[2,1,128], index: 6, kind: input, shape index: {}]   ;;  %s2212_s7 = inlined_call_operand.hbm [shape: f32[2,8,128], index: 7, kind: output, shape index: {}]  }
   0x1   :  { %2234 = sst [smem:[#allocation26_spill]] %s2206_s1 }
   0x2   :  { %2235 = sst [smem:[#allocation27_spill]] %s2208_s3 }
   0x3   :  { %2236 = sst [smem:[#allocation28_spill]] %s2210_s5 }
   0x4   :  { %2237 = sst [smem:[#allocation29_spill]] %s2212_s7 }
   0x5   :  { %12 = vsyncpa [#allocation3], 0 }
   0x6   :  { %14 = vsyncpa [#allocation3 + $0x1], 0 }
   0x7   :  { %15 = vsyncpa [#allocation6], 0 }
   0x8   :  { %16 = vsyncpa [#allocation9], 0 }
   0x9   :  { %18 = vsyncpa [#allocation9 + $0x1], 0 }
   0xa   :  { %19 = vsyncpa [#allocation12], 0 }
   0xb   :  { %21 = vsyncpa [#allocation12 + $0x1], 0 }
   0xc   :  { %22 = vsyncpa [#allocation4], 0 }
   0xd   :  { %24 = vsyncpa [#allocation4 + $0x1], 0  ;;  %s1765_s24 = smov 0   ;;  %s1767_s25 = smov 0  }
   0xe   :  { %s1769_s26 = smov 0   ;;  %s1771_s27 = smov 0  }
   0xf   :  { %s1773_s28 = smov 0   ;;  %s1775_s29 = smov 0  }
  0x10 LB: > { %2238 = sst [smem:[#allocation20_spill]] %s1688_s24  ;;  %s1796_s30 = sadd.s32 4294967295, %s1708_s29   ;;  %s1708_s29 = sphi %s1775_s29, %s30_s29   ;;  %s1704_s28 = sphi %s1773_s28, %s2287_s28   ;;  %s1700_s27 = sphi %s1771_s27, %s2286_s27   ;;  %s1696_s26 = sphi %s1769_s26, %s2285_s26   ;;  %s1692_s25 = sphi %s1767_s25, %s2284_s25   ;;  %s1688_s24 = sphi %s1765_s24, %s2283_s24  }
  0x11   : > { %2239 = sst [smem:[#allocation21_spill]] %s1700_s27  ;;  %s1125_s8 = sadd.s32 4294967294, %s1708_s29  }
  0x12   : > { %p58_p0 = scmp.ne.s32.totalorder %s1696_s26, %s1692_s25  ;;  %p59_p1 = scmp.eq.s32.totalorder %s1708_s29, 0 }
  0x13   : > { %p64_p2 = scmp.ne.s32.totalorder %s1692_s25, %s1688_s24  ;;  %p2214_p3 = scmp.eq.s32.totalorder %s1796_s30, 0 }
  0x14   : > { %p236_p4 = scmp.eq.s32.totalorder %s1796_s30, 1  ;;  %p1807_p5 = por %p59_p1, %p58_p0 }
  0x15   : > { %p242_p6 = scmp.eq.s32.totalorder %s1125_s8, 1  ;;  %p1813_p7 = por %p2214_p3, %p64_p2 }
  0x16   : > { %p1817_p8 = por %p236_p4, %p58_p0  ;;  %p1126_p10 = scmp.ge.s32.totalorder %s1708_s29, 1 }
  0x17   : > { %s2241_s11 = scalar_select %p1813_p7, 1, 0 }
  0x18   : > { %s2242_s12 = scalar_select %p1817_p8, 1, 0 }
  0x19   : > { %p1821_p9 = por %p242_p6, %p64_p2  ;;  %p249_p11 = scmp.lt.s32.totalorder %s1708_s29, 3 }
  0x1a   : > { %2243 = sst [smem:[#allocation22_spill]] %s2242_s12  ;;  %s1710_s15 = smov [#allocation5]  }
  0x1b   : > { %s2244_s13 = scalar_select %p1821_p9, 1, 0 }
  0x1c   : > { %p1827_p12 = pnand %p1126_p10, %p249_p11  ;;  %s261_s16 = sshll.u32 %s1710_s15, 4  ;;  %s1831_s16 = int_to_ptr.vmem [resolvable:$true] %s261_s16 }
  0x1d   : > { %2245 = sst [smem:[#allocation23_spill]] %s2244_s13  ;;  %s42_s18 = sadd.s32 1, %s1704_s28 }
  0x1e   : > { %s2246_s14 = scalar_select %p1827_p12, 1, 0 }
  0x1f   : > { %p1270_p13 = pneg %p1827_p12  ;;  %s1845_s19 = sand.u32 1, %s1696_s26  }
  0x20   : > { %p1847_p4 = scmp.ge.s32.totalorder %s42_s18, 2  ;;  %s2249_s1 = sld [smem:[#allocation26_spill]] }
  0x21   : > { %p1839_p2 = pnand %p1270_p13, %p2214_p3 }
  0x23   : > { %s2247_s17 = scalar_select %p1839_p2, 1, 0 }
  0x24   : > { %p2226_p10 = pneg %p1839_p2 }
  0x26   : > { %s1408_s23 = scalar_lea.hbm %s2249_s1, 1024 }
  0x27   : > { %p1409_p6 = scmp.ne.s32.totalorder %s2249_s1, %s1408_s23  ;;  %p1415_p0 = scmp.lt.u32.totalorder %s1408_s23, %s2249_s1 }
  0x29   : > { %p1411_p11 = pnand %p2226_p10, %p1409_p6 }
  0x2b   : > { %p1412_p13 = pneg %p1411_p11 }
  0x2d   : > { %p1417_p3 = pnand %p1415_p0, %p1412_p13 }
  0x2f   : > { %1420 = shalt.err (!%p1417_p3)
}
  0x30   : > { %s1421_s21 = scalar_lea.vmem %s1831_s16, 1024  ;;  %p1429_p7 = scmp.lt.s32.totalorder %s1831_s16, %s1831_s16 }
  0x31   : > { %p1422_p1 = scmp.ne.s32.totalorder %s1831_s16, %s1421_s21  ;;  %p1430_p6 = scmp.lt.s32.totalorder %s1421_s21, %s1421_s21 }
  0x33   : > { %p1424_p9 = pnand %p1422_p1, %p2226_p10  ;;  %p1431_p11 = por %p1430_p6, %p1429_p7 }
  0x35   : > { %p1425_p8 = pneg %p1424_p9 }
  0x37   : > { %p1432_p12 = pnand %p1431_p11, %p1425_p8 }
  0x39   : > { %1435 = shalt.err (!%p1432_p12)
}
  0x3a   : > { %s2222_s9 = smov 64   ;;  %s2223_s13 = smov 4  }
  0x3b   : > { %1273 = dma.hbm_to_vmem [thread:$0]  (!%p1839_p2), %s2249_s1, 1024, %s1831_s16, [#allocation6], %s2222_s9, %s2222_s9, %s2223_s13  }
  0x3c   : > { %s2289_s18 = smov (%p1847_p4, %s42_s18), 0  ;;  %p2251_p3 = scmp.lt.s32.totalorder %s1708_s29, 2 }
  0x3d   : > { %2250 = sst [smem:[#allocation24_spill]] %s2289_s18  ;;  %s2225_s15 = sand.u32 1, %s1708_s29  }
  0x3e   : > { %p1889_p7 = pnand %p2251_p3, %p1807_p5  ;;  %s46_s21 = ssub.s32 %s1704_s28, %s2289_s18 }
  0x3f   : > { %p49_p8 = scmp.eq.s32.totalorder %s46_s21, 0  ;;  %s2224_s24 = sshll.u32 %s1845_s19, 7 }
  0x40   : > { %s2252_s8 = scalar_select %p1889_p7, 1, 0 }
  0x41   : > { %s1196_s7 = sshll.u32 %s1704_s28, 11  ;;  %s2253_s12 = sadd.s32 1, %s1696_s26 }
  0x42   : > { %s1901_s27 = scalar_select %p49_p8, %s1696_s26, %s2253_s12  }
  0x43   : > { %s2255_s3 = sld [smem:[#allocation27_spill]]  ;;  %s309_s22 = scalar_lea.vmem [#allocation8], %s2224_s24 }
  0x44   : > { %2254 = sst [smem:[#allocation25_spill]] %s1901_s27  ;;  %s316_s23 = sshll.u32 %s309_s22, 4  ;;  %s1912_s23 = int_to_ptr.vmem [resolvable:$true] %s316_s23 }
  0x45   : > { %s1916_s21 = scalar_lea.sflag [#allocation9], %s2225_s15  ;;  %p1922_p9 = pneg %p1889_p7 }
  0x47   : > { %s2256_s9 = scalar_select %p1922_p9, 1, 0 }
  0x49   : > { %s1908_s10 = scalar_lea.hbm %s2255_s3, %s1196_s7  ;;  %s1441_s22 = scalar_lea.hbm %s2255_s3, 4096 }
  0x4a   : > { %s1436_s12 = scalar_lea.hbm %s1908_s10, 2048  ;;  %p1442_p1 = scmp.lt.u32.totalorder %s1908_s10, %s2255_s3 }
  0x4b   : > { %p1437_p5 = scmp.ne.s32.totalorder %s1908_s10, %s1436_s12  ;;  %p1443_p4 = scmp.lt.u32.totalorder %s1441_s22, %s1436_s12 }
  0x4c   : > { %p1445_p6 = scmp.lt.u32.totalorder %s1436_s12, %s1908_s10 }
  0x4d   : > { %p1439_p12 = pnand %p1922_p9, %p1437_p5  ;;  %p1444_p13 = por %p1443_p4, %p1442_p1 }
  0x4f   : > { %p1440_p0 = pneg %p1439_p12  ;;  %p1446_p11 = por %p1445_p6, %p1444_p13 }
  0x51   : > { %p1447_p3 = pnand %p1446_p11, %p1440_p0 }
  0x53   : > { %1450 = shalt.err (!%p1447_p3)
}
  0x54   : > { %s1451_s15 = scalar_lea.vmem %s1912_s23, 2048  ;;  %s1713_s16 = smov [#allocation8]  }
  0x55   : > { %p1452_p8 = scmp.ne.s32.totalorder %s1912_s23, %s1451_s15  ;;  %s1456_s20 = sshll.u32 %s1713_s16, 4  ;;  %s1457_s20 = int_to_ptr.vmem [resolvable:$false] %s1456_s20 }
  0x56   : > { %s1458_s24 = scalar_lea.vmem %s1457_s20, 4096  ;;  %p1459_p10 = scmp.lt.s32.totalorder %s1912_s23, %s1457_s20 }
  0x57   : > { %p1454_p5 = pnand %p1452_p8, %p1922_p9  ;;  %p1460_p2 = scmp.lt.s32.totalorder %s1458_s24, %s1451_s15 }
  0x59   : > { %p1455_p12 = pneg %p1454_p5  ;;  %p1461_p1 = por %p1460_p2, %p1459_p10 }
  0x5b   : > { %p1462_p4 = pnand %p1461_p1, %p1455_p12 }
  0x5d   : > { %1465 = shalt.err (!%p1462_p4)
}
  0x5e   : > { %s1714_s13 = smov 128   ;;  %s1715_s12 = smov 8  }
  0x5f   : > { %1283 = dma.hbm_to_vmem [thread:$0]  (!%p1889_p7), %s1908_s10, 2048, %s1912_s23, %s1916_s21, %s1714_s13, %s1714_s13, %s1715_s12  }
  0x60   : > { %s2257_s5 = sld [smem:[#allocation28_spill]]  ;;  %s2258_s20 = sshll.u32 %s1845_s19, 7 }
  0x61   : > { %s349_s24 = scalar_lea.vmem [#allocation11], %s2258_s20  ;;  %s2259_s3 = sand.u32 1, %s1708_s29  }
  0x62   : > { %s356_s1 = sshll.u32 %s349_s24, 4  ;;  %s1959_s18 = scalar_lea.sflag [#allocation12], %s2259_s3  ;;  %s1955_s1 = int_to_ptr.vmem [resolvable:$true] %s356_s1 }
  0x66   : > { %s1951_s15 = scalar_lea.hbm %s2257_s5, %s1196_s7  ;;  %s1471_s23 = scalar_lea.hbm %s2257_s5, 4096 }
  0x67   : > { %s1466_s27 = scalar_lea.hbm %s1951_s15, 2048  ;;  %p1472_p13 = scmp.lt.u32.totalorder %s1951_s15, %s2257_s5 }
  0x68   : > { %p1467_p2 = scmp.ne.s32.totalorder %s1951_s15, %s1466_s27  ;;  %p1473_p6 = scmp.lt.u32.totalorder %s1471_s23, %s1466_s27 }
  0x69   : > { %p1475_p3 = scmp.lt.u32.totalorder %s1466_s27, %s1951_s15 }
  0x6a   : > { %p1469_p10 = pnand %p1467_p2, %p1922_p9  ;;  %p1474_p11 = por %p1473_p6, %p1472_p13 }
  0x6c   : > { %p1470_p0 = pneg %p1469_p10  ;;  %p1476_p8 = por %p1475_p3, %p1474_p11 }
  0x6e   : > { %p1477_p5 = pnand %p1476_p8, %p1470_p0 }
  0x70   : > { %1480 = shalt.err (!%p1477_p5)
}
  0x71   : > { %s1481_s3 = scalar_lea.vmem %s1955_s1, 2048  ;;  %s1716_s22 = smov [#allocation11]  }
  0x72   : > { %p1482_p12 = scmp.ne.s32.totalorder %s1955_s1, %s1481_s3  ;;  %s1486_s16 = sshll.u32 %s1716_s22, 4  ;;  %s1487_s16 = int_to_ptr.vmem [resolvable:$false] %s1486_s16 }
  0x73   : > { %s1488_s20 = scalar_lea.vmem %s1487_s16, 4096  ;;  %p1489_p2 = scmp.lt.s32.totalorder %s1955_s1, %s1487_s16 }
  0x74   : > { %p1484_p1 = pnand %p1482_p12, %p1922_p9  ;;  %p1490_p10 = scmp.lt.s32.totalorder %s1488_s20, %s1481_s3 }
  0x76   : > { %p1485_p4 = pneg %p1484_p1  ;;  %p1491_p13 = por %p1490_p10, %p1489_p2 }
  0x78   : > { %p1492_p6 = pnand %p1491_p13, %p1485_p4 }
  0x7a   : > { %1495 = shalt.err (!%p1492_p6)
}
  0x7b   : > { %s2260_s27 = smov 4   ;;  %s2261_s24 = smov 64  }
  0x7c   : > { %1289 = dma.hbm_to_vmem [thread:$0]  (!%p1889_p7), %s1951_s15, 2048, %s1955_s1, %s1959_s18, %s2261_s24, %s2261_s24, %s2260_s27  }
  0x7d   : > { %s1717_s10 = smov [#allocation7]   ;;  %s1130_s23 = sshll.u32 %s1845_s19, 2 }
  0x7e   : > { %s275_s7 = sshll.u32 %s1717_s10, 4  ;;  %s1496_s3 = scalar_lea.hbm %s2207_s2, 16  ;;  %s276_s7 = int_to_ptr.vmem [resolvable:$true] %s275_s7 }
  0x7f   : > { %p1497_p0 = scmp.ne.s32.totalorder %s2207_s2, %s1496_s3  ;;  %p2262_p11 = scmp.ne.s32.totalorder %s2247_s17, 0 }
  0x80   : > { %p1503_p12 = scmp.lt.u32.totalorder %s1496_s3, %s2207_s2 }
  0x81   : > { %p2263_p3 = pneg %p2262_p11 }
  0x83   : > { %p1499_p8 = pnand %p1497_p0, %p2263_p3 }
  0x85   : > { %p1500_p5 = pneg %p1499_p8 }
  0x87   : > { %p1505_p1 = pnand %p1503_p12, %p1500_p5 }
  0x89   : > { %1508 = shalt.err (!%p1505_p1)
}
  0x8a   : > { %s1509_s1 = scalar_lea.vmem %s276_s7, 16  ;;  %p2264_p2 = pmov %p2263_p3 }
  0x8b   : > { %p1510_p4 = scmp.ne.s32.totalorder %s276_s7, %s1509_s1  ;;  %s1516_s15 = scalar_lea.vmem %s276_s7, 32 }
  0x8c   : > { %p1517_p6 = scmp.lt.s32.totalorder %s276_s7, %s276_s7  ;;  %p1518_p7 = scmp.lt.s32.totalorder %s1516_s15, %s1509_s1 }
  0x8d   : > { %p1512_p10 = pnand %p1510_p4, %p2264_p2 }
  0x8e   : > { %p1519_p9 = por %p1518_p7, %p1517_p6 }
  0x8f   : > { %p1513_p13 = pneg %p1512_p10 }
  0x91   : > { %p1520_p0 = pnand %p1519_p9, %p1513_p13 }
  0x93   : > { %1523 = shalt.err (!%p1520_p0)
}
  0x94   : > { %1276 = dma.hbm_to_vmem [thread:$0]  (!%p2262_p11), %s2207_s2, 16, %s276_s7, [#allocation6]  }
  0x95   : > { %s1131_s24 = sshll.u32 %s1704_s28, 6  ;;  %s290_s3 = scalar_lea.vmem [#allocation2], %s1130_s23 }
  0x96   : > { %s2011_s12 = scalar_lea.hbm %s2205_s0, %s1131_s24  ;;  %s298_s17 = sshll.u32 %s290_s3, 4  ;;  %s2013_s17 = int_to_ptr.vmem [resolvable:$true] %s298_s17 }
  0x97   : > { %s1135_s22 = sshll.u32 %s1845_s19, 1  ;;  %s287_s16 = scalar_lea.sflag [#allocation3], %s1845_s19 }
  0x98   : > { %s1524_s20 = scalar_lea.hbm %s2011_s12, 64  ;;  %p2265_p9 = scmp.ne.s32.totalorder %s2256_s9, 0 }
  0x99   : > { %p1525_p7 = scmp.ne.s32.totalorder %s2011_s12, %s1524_s20  ;;  %s1529_s15 = scalar_lea.hbm %s2205_s0, 128 }
  0x9a   : > { %p1530_p8 = scmp.lt.u32.totalorder %s2011_s12, %s2205_s0  ;;  %p1531_p5 = scmp.lt.u32.totalorder %s1529_s15, %s1524_s20 }
  0x9b   : > { %p1527_p11 = pnand %p1525_p7, %p2265_p9  ;;  %p1533_p1 = scmp.lt.u32.totalorder %s1524_s20, %s2011_s12 }
  0x9c   : > { %p1532_p12 = por %p1531_p5, %p1530_p8 }
  0x9d   : > { %p1528_p3 = pneg %p1527_p11 }
  0x9e   : > { %p1534_p4 = por %p1533_p1, %p1532_p12 }
  0xa0   : > { %p1535_p2 = pnand %p1534_p4, %p1528_p3 }
  0xa2   : > { %1538 = shalt.err (!%p1535_p2)
}
  0xa3   : > { %s1539_s23 = scalar_lea.vmem %s2013_s17, 64  ;;  %s1718_s24 = smov [#allocation2]  }
  0xa4   : > { %p1540_p10 = scmp.ne.s32.totalorder %s2013_s17, %s1539_s23  ;;  %s1544_s10 = sshll.u32 %s1718_s24, 4  ;;  %s1545_s10 = int_to_ptr.vmem [resolvable:$false] %s1544_s10 }
  0xa5   : > { %s1546_s13 = scalar_lea.vmem %s1545_s10, 128  ;;  %p1547_p0 = scmp.lt.s32.totalorder %s2013_s17, %s1545_s10 }
  0xa6   : > { %p1542_p13 = pnand %p1540_p10, %p2265_p9  ;;  %p1548_p7 = scmp.lt.s32.totalorder %s1546_s13, %s1539_s23 }
  0xa8   : > { %p1543_p6 = pneg %p1542_p13  ;;  %p1549_p11 = por %p1548_p7, %p1547_p0 }
  0xaa   : > { %p1550_p8 = pnand %p1549_p11, %p1543_p6 }
  0xac   : > { %1553 = shalt.err (!%p1550_p8)
}
  0xad   : > { %p2266_p3 = scmp.ne.s32.totalorder %s2252_s8, 0  ;;  %s1197_s3 = sshll.u32 %s1704_s28, 5 }
  0xae   : > { %s2042_s1 = scalar_lea.hbm %s2209_s4, %s1197_s3  ;;  %s330_s15 = scalar_lea.vmem [#allocation10], %s1135_s22 }
  0xaf   : > { %1280 = dma.hbm_to_vmem [thread:$0]  (!%p2266_p3), %s2011_s12, 64, %s2013_s17, %s287_s16  }
  0xb0   : > { %s338_s27 = sshll.u32 %s330_s15, 4  ;;  %s1554_s5 = scalar_lea.hbm %s2042_s1, 32  ;;  %s339_s27 = int_to_ptr.vmem [resolvable:$true] %s338_s27 }
  0xb1   : > { %p1555_p5 = scmp.ne.s32.totalorder %s2042_s1, %s1554_s5  ;;  %s1559_s16 = scalar_lea.hbm %s2209_s4, 64 }
  0xb2   : > { %p1560_p4 = scmp.lt.u32.totalorder %s2042_s1, %s2209_s4  ;;  %p1561_p2 = scmp.lt.u32.totalorder %s1559_s16, %s1554_s5 }
  0xb3   : > { %p1557_p12 = pnand %p1555_p5, %p2265_p9  ;;  %p1563_p13 = scmp.lt.u32.totalorder %s1554_s5, %s2042_s1 }
  0xb4   : > { %p1562_p10 = por %p1561_p2, %p1560_p4 }
  0xb5   : > { %p1558_p1 = pneg %p1557_p12 }
  0xb6   : > { %p1564_p6 = por %p1563_p13, %p1562_p10 }
  0xb8   : > { %p1565_p0 = pnand %p1564_p6, %p1558_p1 }
  0xba   : > { %1568 = shalt.err (!%p1565_p0)
}
  0xbb   : > { %s1569_s22 = scalar_lea.vmem %s339_s27, 32  ;;  %s1719_s10 = smov [#allocation10]  }
  0xbc   : > { %p1570_p7 = scmp.ne.s32.totalorder %s339_s27, %s1569_s22  ;;  %s1574_s13 = sshll.u32 %s1719_s10, 4  ;;  %s1575_s13 = int_to_ptr.vmem [resolvable:$false] %s1574_s13 }
  0xbd   : > { %s1576_s3 = scalar_lea.vmem %s1575_s13, 64  ;;  %p1577_p5 = scmp.lt.s32.totalorder %s339_s27, %s1575_s13 }
  0xbe   : > { %p1572_p11 = pnand %p1570_p7, %p2265_p9  ;;  %p1578_p12 = scmp.lt.s32.totalorder %s1576_s3, %s1569_s22 }
  0xc0   : > { %p1573_p8 = pneg %p1572_p11  ;;  %p1579_p3 = por %p1578_p12, %p1577_p5 }
  0xc2   : > { %p1580_p2 = pnand %p1579_p3, %p1573_p8 }
  0xc4   : > { %1583 = shalt.err (!%p1580_p2)
}
  0xc5   : > { %p2267_p4 = scmp.ne.s32.totalorder %s2252_s8, 0  ;;  %s1141_s20 = sshll.u32 %s1704_s28, 4 }
  0xc6   : > { %s369_s7 = scalar_lea.vmem [#allocation13], %s1845_s19  ;;  %s374_s17 = scalar_lea.hbm %s2211_s6, %s1141_s20 }
  0xc7   : > { %1286 = dma.hbm_to_vmem [thread:$0]  (!%p2267_p4), %s2042_s1, 32, %s339_s27, %s1916_s21  }
  0xc8   : > { %s376_s15 = sshll.u32 %s369_s7, 4  ;;  %s1584_s16 = scalar_lea.hbm %s374_s17, 16  ;;  %s377_s15 = int_to_ptr.vmem [resolvable:$true] %s376_s15 }
  0xc9   : > { %p1585_p1 = scmp.ne.s32.totalorder %s374_s17, %s1584_s16  ;;  %s1589_s22 = scalar_lea.hbm %s2211_s6, 32 }
  0xca   : > { %p1590_p13 = scmp.lt.u32.totalorder %s374_s17, %s2211_s6  ;;  %p1591_p6 = scmp.lt.u32.totalorder %s1589_s22, %s1584_s16 }
  0xcb   : > { %p1587_p3 = pnand %p1585_p1, %p2265_p9  ;;  %p1593_p7 = scmp.lt.u32.totalorder %s1584_s16, %s374_s17 }
  0xcc   : > { %p1592_p0 = por %p1591_p6, %p1590_p13 }
  0xcd   : > { %p1588_p10 = pneg %p1587_p3 }
  0xce   : > { %p1594_p11 = por %p1593_p7, %p1592_p0 }
  0xd0   : > { %p1595_p8 = pnand %p1594_p11, %p1588_p10 }
  0xd2   : > { %1598 = shalt.err (!%p1595_p8)
}
  0xd3   : > { %s1599_s19 = scalar_lea.vmem %s377_s15, 16  ;;  %s1720_s21 = smov [#allocation13]  }
  0xd4   : > { %p1600_p5 = scmp.ne.s32.totalorder %s377_s15, %s1599_s19  ;;  %s1604_s1 = sshll.u32 %s1720_s21, 4  ;;  %s1605_s1 = int_to_ptr.vmem [resolvable:$false] %s1604_s1 }
  0xd5   : > { %s1606_s27 = scalar_lea.vmem %s1605_s1, 32  ;;  %p1607_p1 = scmp.lt.s32.totalorder %s377_s15, %s1605_s1 }
  0xd6   : > { %p1602_p12 = pnand %p1600_p5, %p2265_p9  ;;  %p1608_p3 = scmp.lt.s32.totalorder %s1606_s27, %s1599_s19 }
  0xd8   : > { %p1603_p2 = pneg %p1602_p12  ;;  %p1609_p4 = por %p1608_p3, %p1607_p1 }
  0xda   : > { %p1610_p6 = pnand %p1609_p4, %p1603_p2 }
  0xdc   : > { %1613 = shalt.err (!%p1610_p6)
}
  0xdd   : > { %p2268_p13 = scmp.ne.s32.totalorder %s2252_s8, 0  ;;  %p2269_p10 = scmp.ne.s32.totalorder %s2246_s14, 0 }
  0xde   : > { %s2085_s9 = sand.u32 (!%p2269_p10), 1, %s1692_s25   ;;  %p2270_p9 = scmp.ne.s32.totalorder (!%p2269_p10), %s2241_s11, 0 }
  0xdf   : > { %1292 = dma.hbm_to_vmem [thread:$0]  (!%p2268_p13), %s374_s17, 16, %s377_s15, %s1959_s18  }
  0xe0   : > { %385 = sbr.rel (%p2269_p10) target bundleno = 941 (0x3ad), region = 48  ;;  %s1143_s3 = sshll.u32 (!%p2269_p10), %s2085_s9, 2 }
  0xe1   : > { %s388_s20 = scalar_lea.sflag (!%p2269_p10), [#allocation3], %s2085_s9  ;;  %s2089_s7 = scalar_lea.vmem (!%p2269_p10), [#allocation2], %s1143_s3 }
  0xe7   : > { %1667 = dma.done.wait (%p2270_p9), %s388_s20, 64  }
  0xe8   : > { %1669 = vsyncadd (%p2270_p9), %s388_s20, 4294967232  ;;  %p2271_p4 = scmp.eq.s32.totalorder %s1796_s30, 0 }
  0xea   : > { %1671 = dma.done.wait (%p2271_p4), [#allocation6], 1040   ;;  %p2272_p0 = pmov %p2271_p4 }
  0xeb   : > { %s404_s14 = sand.u32 1, %s1796_s30   ;;  %s1146_s18 = sshll.u32 %s2085_s9, 7 }
  0xec   : > { %1673 = vsyncadd (%p2272_p0), [#allocation6], 4294966256  ;;  %s405_s8 = scalar_lea.sflag [#allocation9], %s404_s14  ;;  %s2101_s15 = scalar_lea.vmem [#allocation8], %s1146_s18 }
  0xed   : > { %1675 = dma.done.wait (%p2270_p9), %s405_s8, 2080  }
  0xee   : > { %1677 = vsyncadd (%p2270_p9), %s405_s8, 4294965216  ;;  %s1147_s5 = sshll.u32 %s2085_s9, 1  ;;  %s423_s17 = scalar_lea.sflag [#allocation12], %s404_s14 }
  0xef   : > { %s2108_s12 = scalar_lea.vmem [#allocation10], %s1147_s5  ;;  %s2110_s16 = scalar_lea.vmem [#allocation11], %s1146_s18 }
  0xf0   : > { %1679 = dma.done.wait (%p2270_p9), %s423_s17, 2064  }
  0xf1   : > { %1681 = vsyncadd (%p2270_p9), %s423_s17, 4294965232  ;;  %v1721_v0 = vmov 0.0   ;;  %vm1722_vm0 = vmmov 0   ;;  %v1360_v1 = vld [vmem:[#allocation5] sm:$0xff]   ;;  %v1361_v2 = vld [vmem:[#allocation5 + $0x8] sm:$0xff]   ;;  %v1723_v26 = vmov 0   ;;  %v616_v50 = vlaneseq }
  0xf2   : > { %1230 = vmatprep.subr.bf16.mxu0 %v1721_v0  ;;  %1246 = vmatprep.mubr.msk.bf16.mxu0 %vm1722_vm0, %v1721_v0  ;;  %v1362_v3 = vld [vmem:[#allocation5 + $0x10] sm:$0xff]   ;;  %v1370_v5 = vld [vmem:[%s2101_s15] ss:$8 sps:$4 sm:$0xff]   ;;  %v1363_v6 = vld [vmem:[#allocation5 + $0x18] sm:$0xff]   ;;  %s2273_s30 = sld [smem:[#allocation21_spill]]  ;;  %s1149_s11 = sshll.u32 %s2085_s9, 3 }
  0xf3   : > { %1231 = vmatpush3.bf16.msra.mxu0 %v1360_v1  ;;  %v1368_v4 = vld [vmem:[%s2101_s15 + $0x4] ss:$8 sps:$4 sm:$0xff]   ;;  %v1371_v7 = vld [vmem:[%s2101_s15 + $0x14] ss:$8 sps:$4 sm:$0xff]   ;;  %v1373_v8 = vld [vmem:[%s2101_s15 + $0x10] ss:$8 sps:$4 sm:$0xff]   ;;  %738 = vmatprep.mubr.bf16.mxu1 %v1723_v26 }
  0xf4   : > { %1232 = vmatprep.subr.bf16.mxu0 %v1721_v0  ;;  %706 = vmatprep.subr.bf16.mxu1 %v1368_v4  ;;  %v1374_v9 = vld [vmem:[%s2101_s15 + $0x24] ss:$8 sps:$4 sm:$0xff]   ;;  %v1376_v11 = vld [vmem:[%s2101_s15 + $0x20] ss:$8 sps:$4 sm:$0xff]   ;;  %v1377_v13 = vld [vmem:[%s2101_s15 + $0x34] ss:$8 sps:$4 sm:$0xff]  }
  0xf5   : > { %707 = vmatpush1.bf16.msra.mxu1 %v1370_v5  ;;  %v1364_v10 = vld [vmem:[#allocation5 + $0x20] sm:$0xff]   ;;  %v1365_v12 = vld [vmem:[#allocation5 + $0x28] sm:$0xff]   ;;  %v1379_v14 = vld [vmem:[%s2101_s15 + $0x30] ss:$8 sps:$4 sm:$0xff]   ;;  %v617_v51 = vshrl.u32 %v616_v50, 7  ;;  %s434_s23 = scalar_lea.vmem [#allocation13], %s2085_s9 }
  0xf6   : > { %708 = vmatprep.subr.bf16.mxu1 %v1371_v7  ;;  %v1380_v15 = vld [vmem:[%s2101_s15 + $0x44] ss:$8 sps:$4 sm:$0xff]   ;;  %v1382_v17 = vld [vmem:[%s2101_s15 + $0x40] ss:$8 sps:$4 sm:$0xff]   ;;  %v1383_v18 = vld [vmem:[%s2101_s15 + $0x54] ss:$8 sps:$4 sm:$0xff]  }
  0xf7   : > { %1233 = vmatpush3.bf16.msra.mxu0 %v1361_v2  ;;  %v1366_v16 = vld [vmem:[#allocation5 + $0x30] sm:$0xff]   ;;  %v1367_v19 = vld [vmem:[#allocation5 + $0x38] sm:$0xff]   ;;  %v1388_v23 = vld [vmem:[%s2101_s15 + $0x60] ss:$8 sps:$4 sm:$0xff]   ;;  %v618_v52 = vsub.s32 0, %v617_v51  ;;  %v622_v54 = vsub.s32 1, %v617_v51 }
  0xf8   : > { %1234 = vmatprep.subr.bf16.mxu0 %v1721_v0  ;;  %v1385_v20 = vld [vmem:[%s2101_s15 + $0x50] ss:$8 sps:$4 sm:$0xff]   ;;  %v1386_v21 = vld [vmem:[%s2101_s15 + $0x64] ss:$8 sps:$4 sm:$0xff]   ;;  %v1389_v24 = vld [vmem:[%s2101_s15 + $0x74] ss:$8 sps:$4 sm:$0xff]  }
  0xf9   : > { %709 = vmatpush1.bf16.msra.mxu1 %v1373_v8  ;;  %v485_v22 = vld [vmem:[%s2089_s7] sm:$0xf]  ;;  %v1392_v27 = vld [vmem:[%s2110_s16 + $0x40] sm:$0xff]   ;;  %v1394_v29 = vld [vmem:[%s2110_s16 + $0x48] sm:$0xff]   ;;  %s2274_s24 = sld [smem:[#allocation22_spill]]  ;;  %s1193_s22 = sshll.u32 %s2273_s30, 7 }
  0xfa   : > { %710 = vmatprep.subr.bf16.mxu1 %v1374_v9  ;;  %v1391_v25 = vld [vmem:[%s2101_s15 + $0x70] ss:$8 sps:$4 sm:$0xff]   ;;  %v1393_v28 = vld [vmem:[%s2110_s16] sm:$0xff]   ;;  %v1398_v33 = vld [vmem:[%s2110_s16 + $0x58] sm:$0xff]   ;;  %s483_s10 = scalar_lea.vmem [#allocation14], %s1149_s11  ;;  %s2275_s1 = sld [smem:[#allocation29_spill]] }
  0xfb   : > { %1235 = vmatpush3.bf16.msra.mxu0 %v1362_v3  ;;  %v1395_v30 = vld [vmem:[%s2110_s16 + $0x8] sm:$0xff]   ;;  %v1396_v31 = vld [vmem:[%s2110_s16 + $0x50] sm:$0xff]   ;;  %v1399_v34 = vld [vmem:[%s2110_s16 + $0x18] sm:$0xff]   ;;  %s942_s13 = sshll.u32 %s483_s10, 4  ;;  %s928_s3 = scalar_lea.sflag [#allocation4], %s2085_s9  ;;  %s2158_s13 = int_to_ptr.vmem [resolvable:$true] %s942_s13 }
  0xfc   : > { %1236 = vmatprep.subr.bf16.mxu0 %v1721_v0  ;;  %v1397_v32 = vld [vmem:[%s2110_s16 + $0x10] sm:$0xff]   ;;  %v1400_v35 = vld [vmem:[%s2110_s16 + $0x60] sm:$0xff]   ;;  %v1402_v37 = vld [vmem:[%s2110_s16 + $0x68] sm:$0xff]   ;;  %s1614_s20 = scalar_lea.vmem %s2158_s13, 128  ;;  %s1724_s7 = smov [#allocation14]  }
  0xfd   : > { %711 = vmatpush1.bf16.msra.mxu1 %v1376_v11  ;;  %v1401_v36 = vld [vmem:[%s2110_s16 + $0x20] sm:$0xff]   ;;  %v1403_v38 = vld [vmem:[%s2110_s16 + $0x28] sm:$0xff]   ;;  %v1150_v39 = vld [vmem:[#allocation7] ss:$0 sm:$0xff]  ;;  %p1615_p7 = scmp.ne.s32.totalorder %s2158_s13, %s1614_s20  ;;  %s1618_s14 = sshll.u32 %s1724_s7, 4  ;;  %s1619_s14 = int_to_ptr.vmem [resolvable:$false] %s1618_s14 }
  0xfe   : > { %712 = vmatprep.subr.bf16.mxu1 %v1377_v13  ;;  %v1404_v46 = vld [vmem:[%s2110_s16 + $0x70] sm:$0xff]   ;;  %v1406_v48 = vld [vmem:[%s2110_s16 + $0x78] sm:$0xff]   ;;  %s1620_s18 = scalar_lea.vmem %s1619_s14, 256  ;;  %p1621_p12 = scmp.lt.s32.totalorder %s2158_s13, %s1619_s14 }
  0xff   : > { %1237 = vmatpush3.bf16.msra.mxu0 %v1363_v6  ;;  %v1405_v47 = vld [vmem:[%s2110_s16 + $0x30] sm:$0xff]   ;;  %v1407_v49 = vld [vmem:[%s2110_s16 + $0x38] sm:$0xff]   ;;  %p2276_p11 = scmp.ne.s32.totalorder %s2274_s24, 0  ;;  %p1622_p2 = scmp.lt.s32.totalorder %s1620_s18, %s1614_s20 }
 0x100   : > { %1238 = vmatprep.subr.bf16.mxu0 %v1721_v0  ;;  %v614_v53 = vld [vmem:[%s2108_s12] sm:$0x3]  ;;  %v1175_v4 = vld [vmem:[%s434_s23] ss:$0 sm:$0xff]  ;;  %s2156_s27 = scalar_lea.hbm %s2275_s1, %s1193_s22 }
 0x101   : > { %713 = vmatpush1.bf16.msra.mxu1 %v1379_v14  ;;  %v619_v55 = vrot.slane %v614_v53, %v618_v52  ;;  %v623_v56 = vrot.slane %v614_v53, %v622_v54  ;;  %p1616_p8 = pnand %p1615_p7, %p2276_p11  ;;  %p1623_p1 = por %p1622_p2, %p1621_p12 }
 0x102   : > { %714 = vmatprep.subr.bf16.mxu1 %v1380_v15 }
 0x103   : > { %1239 = vmatpush3.bf16.msra.mxu0 %v1364_v10  ;;  %p1617_p5 = pneg %p1616_p8 }
 0x104   : > { %1240 = vmatprep.subr.bf16.mxu0 %v1721_v0 }
 0x105   : > { %715 = vmatpush1.bf16.msra.mxu1 %v1382_v17  ;;  %p1624_p3 = pnand %p1623_p1, %p1617_p5 }
 0x106   : > { %716 = vmatprep.subr.bf16.mxu1 %v1383_v18 }
 0x107   : > { %1241 = vmatpush3.bf16.msra.mxu0 %v1365_v12 }
 0x108   : > { %1242 = vmatprep.subr.bf16.mxu0 %v1721_v0 }
 0x109   : > { %717 = vmatpush1.bf16.msra.mxu1 %v1385_v20 }
 0x10a   : > { %718 = vmatprep.subr.bf16.mxu1 %v1386_v21 }
 0x10b   : > { %1243 = vmatpush3.bf16.msra.mxu0 %v1366_v16 }
 0x10c   : > { %1244 = vmatprep.subr.bf16.mxu0 %v1721_v0 }
 0x10d   : > { %719 = vmatpush1.bf16.msra.mxu1 %v1388_v23 }
 0x10e   : > { %720 = vmatprep.subr.bf16.mxu1 %v1389_v24 }
 0x10f   : > { %1245 = vmatpush3.bf16.msra.mxu0 %v1367_v19 }
 0x110   : > { %1208 = vmatprep.subr.bf16.mxu0 %v1392_v27 }
 0x111   : > { %721 = vmatpush1.bf16.msra.mxu1 %v1391_v25 }
 0x112   : > { %1247 = vmatmul.mubr.bf16.vlgmr.msra.gmra.mrb[0].mxu0 %v485_v22 }
 0x113   : > { %1209 = vmatpush3.bf16.msra.mxu0 %v1393_v28 }
 0x114   : > { %1210 = vmatprep.subr.bf16.mxu0 %v1394_v29 }
 0x117   : > { %1211 = vmatpush3.bf16.msra.mxu0 %v1395_v30 }
 0x118   : > { %1212 = vmatprep.subr.bf16.mxu0 %v1396_v31 }
 0x11b   : > { %1213 = vmatpush3.bf16.msra.mxu0 %v1397_v32 }
 0x11c   : > { %1214 = vmatprep.subr.bf16.mxu0 %v1398_v33 }
 0x11f   : > { %1215 = vmatpush3.bf16.msra.mxu0 %v1399_v34 }
 0x120   : > { %1216 = vmatprep.subr.bf16.mxu0 %v1400_v35 }
 0x123   : > { %1217 = vmatpush3.bf16.msra.mxu0 %v1401_v36 }
 0x124   : > { %1218 = vmatprep.subr.bf16.mxu0 %v1402_v37 }
 0x127   : > { %1219 = vmatpush3.bf16.msra.mxu0 %v1403_v38 }
 0x128   : > { %1220 = vmatprep.subr.bf16.mxu0 %v1404_v46 }
 0x12b   : > { %1221 = vmatpush3.bf16.msra.mxu0 %v1405_v47 }
 0x12c   : > { %1222 = vmatprep.subr.bf16.mxu0 %v1406_v48 }
 0x12f   : > { %1223 = vmatpush3.bf16.msra.mxu0 %v1407_v49 }
 0x1e5   : > { %v591_v40 = vpop.f32.mrb[0].mxu0 }
 0x1e6   : > { %v592_v41 = vadd.f32 %v1150_v39, %v591_v40  ;;  %v1248_v42 = vpop.f32.mrb[1].mxu0 }
 0x1e7   : > { %v594_v43 = vpop.f32.mrb[2].mxu0 }
 0x1e8   : > { %v597_v44 = vpack.c.bf16 %v592_v41, %v592_v41  ;;  %v1249_v45 = vpop.f32.mrb[3].mxu0 }
 0x1ea   : > { %739 = vmatmul.mubr.bf16.vlgmr.msra.gmra.mrb[0].mxu1 %v597_v44 }
 0x2bd   : > { %v740_v57 = vpop.f32.mrb[0].mxu1 }
 0x2be   : > { %v741_v58 = vadd.f32 %v740_v57, %v619_v55  ;;  %v742_v59 = vpop.f32.mrb[1].mxu1 }
 0x2bf   : > { %v743_v60 = vadd.f32 %v742_v59, %v623_v56  ;;  %v744_v61 = vpop.f32.mrb[2].mxu1 }
 0x2c0   : > { %v747_v62 = vmax.f32 %v741_v58, 0.0  ;;  %v745_v63 = vpop.f32.mrb[3].mxu1 }
 0x2c1   : > { %v748_v0 = vmax.f32 %v743_v60, 0.0 }
 0x2c2   : > { %v749_v2 = vpack.c.bf16 %v747_v62, %v747_v62 }
 0x2c3   : > { %v750_v1 = vpack.c.bf16 %v748_v0, %v748_v0 }
 0x2c5   : > { %918 = vmatprep.mubr.bf16.mxu0 %v750_v1 }
 0x2c6   : > { %919 = vmatmul.mubr.bf16.vlgmr.msra.gmra.mrb[4].mxu0 %v749_v2 }
 0x399   : > { %v1224_v3 = vpop.f32.mrb[4].mxu0 }
 0x39a   : > { %v1225_v5 = vpop.f32.mrb[5].mxu0 }
 0x39b   : > { %v1226_v6 = vadd.f32 %v1225_v5, %v1224_v3  ;;  %v1227_v7 = vpop.f32.mrb[6].mxu0 }
 0x39c   : > { %v1228_v8 = vpop.f32.mrb[7].mxu0 }
 0x39d   : > { %v921_v9 = vadd.f32 %v1226_v6, %v1175_v4 }
 0x39f   : > { %926 = vst [vmem:[%s483_s10] sm:$0xff] %v921_v9 }
 0x3a0   : > { %1627 = shalt.err (!%p1624_p3)
}
 0x3a1   : > { %s1628_s9 = scalar_lea.hbm %s2156_s27, 128  ;;  %s1632_s5 = scalar_lea.hbm %s2275_s1, 256 }
 0x3a2   : > { %p1629_p6 = scmp.ne.s32.totalorder %s2156_s27, %s1628_s9  ;;  %p1633_p9 = scmp.lt.u32.totalorder %s2156_s27, %s2275_s1 }
 0x3a3   : > { %p1634_p4 = scmp.lt.u32.totalorder %s1632_s5, %s1628_s9  ;;  %p1636_p7 = scmp.lt.u32.totalorder %s1628_s9, %s2156_s27 }
 0x3a4   : > { %p1630_p13 = pnand %p1629_p6, %p2276_p11 }
 0x3a5   : > { %p1635_p0 = por %p1634_p4, %p1633_p9 }
 0x3a6   : > { %p1631_p10 = pneg %p1630_p13 }
 0x3a7   : > { %p1637_p8 = por %p1636_p7, %p1635_p0 }
 0x3a9   : > { %p1638_p5 = pnand %p1637_p8, %p1631_p10 }
 0x3ab   : > { %1641 = shalt.err (!%p1638_p5)
}
 0x3ac   : > { %1268 = dma.vmem_to_hbm [thread:$0]  (%p2276_p11), %s2158_s13, 128, %s2156_s27, %s928_s3  }
 0x3ad PF: > { %s2277_s16 = sld [smem:[#allocation20_spill]]  ;;  %s2278_s30 = sld [smem:[#allocation23_spill]] }
 0x3ae   : > { %p2280_p2 = scmp.ge.s32.totalorder %s1708_s29, 2 }
 0x3b3   : > { %s954_s11 = sand.u32 1, %s2277_s16   ;;  %p2279_p12 = scmp.ne.s32.totalorder %s2278_s30, 0 }
 0x3b4   : > { %s955_s23 = scalar_lea.sflag [#allocation4], %s954_s11 }
 0x3b5   : > { %p1294_p1 = pnand %p2280_p2, %p2279_p12 }
 0x3b7   : > { %1683 = dma.done.wait (!%p1294_p1), %s955_s23, 128  }
 0x3b8   : > { %1685 = vsyncadd (!%p1294_p1), %s955_s23, 4294967168  ;;  %s30_s29 = sadd.s32 1, %s1708_s29   ;;  %s2281_s22 = sld [smem:[#allocation25_spill]] }
 0x3b9   : > { %p27_p3 = scmp.ge.s32.totalorder %s30_s29, 4   ;;  %s2282_s10 = sld [smem:[#allocation24_spill]] }
 0x3ba   : > { %s2283_s24 = smov %s1692_s25  ;;  %s2284_s25 = smov %s1696_s26 }
 0x3bb   : > { %s2286_s27 = smov %s1704_s28  ;;  %29 = sbr.rel (!%p27_p3) target bundleno = 16 (0x10), region = 149 }
 0x3be   : > { %s2285_s26 = smov %s2281_s22 }
 0x3bf   : > { %s2287_s28 = smov %s2282_s10 }
 0x3c2   :  { %960 = vsyncpa [#allocation3], 1 }
 0x3c3   :  { %962 = vsyncpa [#allocation3 + $0x1], 1 }
 0x3c4   :  { %963 = vsyncpa [#allocation6], 1 }
 0x3c5   :  { %964 = vsyncpa [#allocation9], 1 }
 0x3c6   :  { %966 = vsyncpa [#allocation9 + $0x1], 1 }
 0x3c7   :  { %967 = vsyncpa [#allocation12], 1 }
 0x3c8   :  { %969 = vsyncpa [#allocation12 + $0x1], 1 }
 0x3c9   :  { %970 = vsyncpa [#allocation4], 1 }
 0x3ca   :  { %972 = vsyncpa [#allocation4 + $0x1], 1 }

</bundles_post_ra>
